<compile_context>
chip_gen: v6e
topology: v6e:2x2x1
jax: 0.10.0
libtpu: 0.0.40
codegen_flags: <defaults>
</compile_context>

<pallas_src>
import functools
import math

import jax
import jax.numpy as jnp
import numpy as np
from jax import lax
from jax.experimental import pallas as pl
from jax.experimental.pallas import tpu as pltpu


# ----------------------------- Pallas kernel --------------------------------

def _attention1d_kernel(x_ref, wc_ref, bc_ref, wqkv_ref, bqkv_ref,
                        wo_ref, bo_ref, o_ref, *, num_heads, head_dim, batch):
    """Fused 1x1-conv + multi-head self-attention, whole batch per invocation.

    Channel-major (NCW) layout: the sequence axis sits on lanes and the batch
    is folded onto the lane axis for every projection matmul.

    x_ref    : (B, Cin, Lp)  bf16  pixel-unshuffled input, NCW
    wc_ref   : (E, Cin)      bf16  conv1x1 weight (native PyTorch orientation)
    bc_ref   : (E, 1)        f32   conv1x1 bias
    wqkv_ref : (3E, E)       bf16  packed in-projection weight
    bqkv_ref : (3E, 1)       f32   packed in-projection bias
    wo_ref   : (E, E)        bf16  out-projection weight
    bo_ref   : (E, 1)        f32   out-projection bias
    o_ref    : (B, E, Lp)    bf16  output, NCW
    """
    e = wo_ref.shape[0]
    lp = x_ref.shape[2]
    scale = 1.0 / math.sqrt(head_dim)

    wc = wc_ref[...]
    wqkv = wqkv_ref[...]
    wo = wo_ref[...]
    bc = bc_ref[...]
    bqkv = bqkv_ref[...]
    bo = bo_ref[...]

    # Fold the batch onto the lane axis: (Cin, B*Lp).  B is tiny, static concat.
    # TODO(synk): for large B replace the static unrolls with a grid axis /
    # lax.fori_loop to bound vreg live ranges.
    x_slab = jnp.concatenate([x_ref[i] for i in range(batch)], axis=1)

    # 1x1 conv == (E, Cin) @ (Cin, B*Lp): bf16 MXU, f32 accumulate, bias once.
    x1 = jnp.dot(wc, x_slab, preferred_element_type=jnp.float32) + bc        # (E, B*Lp)

    # Packed QKV in-projection over the whole batch slab.
    qkv = jnp.dot(wqkv, x1.astype(jnp.bfloat16),
                  preferred_element_type=jnp.float32) + bqkv                 # (3E, B*Lp)
    qkv16 = qkv.astype(jnp.bfloat16)          # bf16 operands for the MXU dots

    head_rows = []
    for h in range(num_heads):                # static, fully unrolled (tiny)
        lo = h * head_dim
        cols = []
        for b in range(batch):                # per-batch softmax block only
            c0 = b * lp
            qh = qkv16[lo:lo + head_dim, c0:c0 + lp]                 # (d, Lp)
            kh = qkv16[e + lo:e + lo + head_dim, c0:c0 + lp]         # (d, Lp)
            vh = qkv16[2 * e + lo:2 * e + lo + head_dim, c0:c0 + lp] # (d, Lp)

            # Scores: contract the head dim of q with the head dim of k
            # (no .T -> no XLU transpose); bf16 operands, f32 accumulation.
            s = lax.dot_general(qh, kh, (((0,), (0,)), ((), ())),
                                preferred_element_type=jnp.float32) * scale  # (Lq, Lk)

            # Softmax stays in f32 (exp on the otherwise-idle EUP slot).
            s = s - jnp.max(s, axis=-1, keepdims=True)
            p = jnp.exp(s)
            p = p * pl.reciprocal(jnp.sum(p, axis=-1, keepdims=True), approx=True)

            # PV: contract the key dim of v with the key dim of p (== v @ p.T).
            ho = lax.dot_general(vh, p.astype(jnp.bfloat16),
                                 (((1,), (1,)), ((), ())),
                                 preferred_element_type=jnp.float32)         # (d, Lq)
            cols.append(ho)
        head_rows.append(jnp.concatenate(cols, axis=1))                      # (d, B*Lp)

    # In-register head concat along sublanes -> (E, B*Lp); no VMEM scratch.
    att = jnp.concatenate(head_rows, axis=0)

    # ONE packed out-projection for all heads/batches; bias added exactly once.
    out = jnp.dot(wo, att.astype(jnp.bfloat16),
                  preferred_element_type=jnp.float32) + bo                   # (E, B*Lp)

    for b in range(batch):
        o_ref[b] = out[:, b * lp:(b + 1) * lp].astype(o_ref.dtype)


def _attention_core(x_ncw, conv_w, conv_b, in_proj_w, in_proj_b,
                    out_proj_w, out_proj_b, *, num_heads):
    """x_ncw: (B, Cin, Lp) NCW -> (B, E, Lp) NCW (bf16) via the fused kernel."""
    b, cin, lp = x_ncw.shape
    e = conv_w.shape[0]
    head_dim = e // num_heads

    # bf16 operands at the pallas_call boundary; f32 biases / accumulation.
    xb = x_ncw.astype(jnp.bfloat16)
    wc = conv_w[:, :, 0].astype(jnp.bfloat16)              # (E, Cin)
    wqkv = in_proj_w.astype(jnp.bfloat16)                  # (3E, E)
    wo = out_proj_w.astype(jnp.bfloat16)                   # (E, E)
    bc = conv_b.reshape(e, 1).astype(jnp.float32)
    bqkv = in_proj_b.reshape(3 * e, 1).astype(jnp.float32)
    bo = out_proj_b.reshape(e, 1).astype(jnp.float32)

    kernel = functools.partial(_attention1d_kernel,
                               num_heads=num_heads, head_dim=head_dim, batch=b)

    return pl.pallas_call(
        kernel,
        out_shape=jax.ShapeDtypeStruct((b, e, lp), jnp.bfloat16),
        grid_spec=pltpu.PrefetchScalarGridSpec(
            num_scalar_prefetch=0,
            # Whole problem in one grid step: per-step pipeline overhead
            # dominates at these sizes.  For production B/L, tile (batch, seq)
            # on leading "parallel" grid axes (feeds both v7x TCs) and
            # re-derive block shapes for the per-generation VMEM budgets.
            grid=(1,),
            in_specs=[
                pl.BlockSpec((b, cin, lp), lambda i: (0, 0, 0)),
                pl.BlockSpec((e, cin), lambda i: (0, 0)),
                pl.BlockSpec((e, 1), lambda i: (0, 0)),
                pl.BlockSpec((3 * e, e), lambda i: (0, 0)),
                pl.BlockSpec((3 * e, 1), lambda i: (0, 0)),
                pl.BlockSpec((e, e), lambda i: (0, 0)),
                pl.BlockSpec((e, 1), lambda i: (0, 0)),
            ],
            out_specs=pl.BlockSpec((b, e, lp), lambda i: (0, 0, 0)),
            scratch_shapes=[],
        ),
        compiler_params=pltpu.CompilerParams(
            dimension_semantics=("arbitrary",)),
    )(xb, wc, bc, wqkv, bqkv, wo, bo)


# ----------------------------- Module wrapper --------------------------------

def attention1d_forward(x, params, *, shuffle_pattern, shuffle_scale, num_heads):
    """Full Attention1d forward.  x: (B, C_in, L) in NCW (PyTorch layout).

    Returns bf16 (kernel writes bf16 to halve HBM writeback bytes)."""
    b, c, l = x.shape

    # PixelUnshuffle1D (torch.reshape semantics: pure row-major reshape).
    if shuffle_pattern in ("BA", "B"):
        x = x.reshape(b, c * shuffle_scale, l // shuffle_scale)

    # Fused conv1x1 + MHA, computed directly in NCW layout (no transposes).
    out = _attention_core(x,
                          params["conv_w"], params["conv_b"],
                          params["in_proj_w"], params["in_proj_b"],
                          params["out_proj_w"], params["out_proj_b"],
                          num_heads=num_heads)                    # (B, E, Lp) bf16

    # PixelShuffle1D (pure reshape).
    if shuffle_pattern in ("BA", "A"):
        bb, cc, ll = out.shape
        out = out.reshape(bb, cc // shuffle_scale, ll * shuffle_scale)
    return out


# --------------------------- pure-JAX reference -------------------------------

def _reference_forward(x, params, *, shuffle_pattern, shuffle_scale, num_heads):
    """Canonical token-major reference (mirrors the PyTorch module) computed
    from the same bf16-rounded operands the kernel sees."""
    b, c, l = x.shape
    if shuffle_pattern in ("BA", "B"):
        x = x.reshape(b, c * shuffle_scale, l // shuffle_scale)

    def rnd(a):  # match the kernel's bf16 operand rounding
        return a.astype(jnp.bfloat16).astype(jnp.float32)

    xt = jnp.transpose(rnd(x), (0, 2, 1))                          # (B, Lp, Cin)
    wc = rnd(params["conv_w"][:, :, 0])                            # (E, Cin)
    bc = params["conv_b"].astype(jnp.float32)
    wqkv = rnd(params["in_proj_w"])                                # (3E, E)
    bqkv = params["in_proj_b"].astype(jnp.float32)
    wo = rnd(params["out_proj_w"])                                 # (E, E)
    bo = params["out_proj_b"].astype(jnp.float32)

    x1 = xt @ wc.T + bc                                            # (B, Lp, E)
    bsz, lp, e = x1.shape
    d = e // num_heads
    qkv = x1 @ wqkv.T + bqkv
    q, k, v = qkv[..., :e], qkv[..., e:2 * e], qkv[..., 2 * e:]

    def split(t):
        return t.reshape(bsz, lp, num_heads, d).transpose(0, 2, 1, 3)

    q, k, v = split(q), split(k), split(v)
    s = jnp.einsum("bhqd,bhkd->bhqk", q, k) / math.sqrt(d)
    p = jax.nn.softmax(s, axis=-1)
    o = jnp.einsum("bhqk,bhkd->bhqd", p, v)
    o = o.transpose(0, 2, 1, 3).reshape(bsz, lp, e)
    o = o @ wo.T + bo
    o = jnp.transpose(o, (0, 2, 1))                                # (B, E, Lp)
    if shuffle_pattern in ("BA", "A"):
        bb, cc, ll = o.shape
        o = o.reshape(bb, cc // shuffle_scale, ll * shuffle_scale)
    return o


# ------------------------------------ main ------------------------------------

if __name__ == "__main__":
    # Mirrors Attention1d(in_channels=4, out_channels=8, num_heads=2,
    #                     shuffle_pattern='BA', shuffle_scale=2)
    in_channels, out_channels = 4, 8
    num_heads = 2
    shuffle_pattern = "BA"
    shuffle_scale = 2
    B, L = 2, 16

    in_eff = in_channels * shuffle_scale     # 8  (conv input channels)
    out_eff = out_channels * shuffle_scale   # 16 (embed dim E)

    key = jax.random.PRNGKey(0)
    k_x, k_cw, k_cb, k_iw, k_ib, k_ow, k_ob = jax.random.split(key, 7)

    x = jax.random.normal(k_x, (B, in_channels, L), dtype=jnp.float32)

    params = {
        "conv_w": 0.1 * jax.random.normal(k_cw, (out_eff, in_eff, 1), jnp.float32),
        "conv_b": 0.1 * jax.random.normal(k_cb, (out_eff,), jnp.float32),
        "in_proj_w": 0.1 * jax.random.normal(k_iw, (3 * out_eff, out_eff), jnp.float32),
        "in_proj_b": 0.1 * jax.random.normal(k_ib, (3 * out_eff,), jnp.float32),
        "out_proj_w": 0.1 * jax.random.normal(k_ow, (out_eff, out_eff), jnp.float32),
        "out_proj_b": 0.1 * jax.random.normal(k_ob, (out_eff,), jnp.float32),
    }

    out = attention1d_forward(
        x, params,
        shuffle_pattern=shuffle_pattern,
        shuffle_scale=shuffle_scale,
        num_heads=num_heads,
    )
    out = jax.block_until_ready(out)

    ref = _reference_forward(
        x, params,
        shuffle_pattern=shuffle_pattern,
        shuffle_scale=shuffle_scale,
        num_heads=num_heads,
    )

    assert out.shape == (B, out_channels, L), out.shape
    # Tolerance accounts for bf16 operands, bf16-cast intermediates feeding the
    # MXU (x1, qkv, p, att), bf16 output storage, and the approx (EUP)
    # reciprocal in the softmax normalization; a layout/semantics bug would
    # produce O(1) relative errors.
    np.testing.assert_allclose(np.asarray(out).astype(np.float32),
                               np.asarray(ref), rtol=5e-2, atol=1e-2)

    print("KERNEL_OK")
</pallas_src>

<mosaic_0001>
module attributes {stable_mosaic.version = 11 : i64} {
  func.func @_attention1d_kernel(%arg0: i32, %arg1: memref<2x8x8xbf16, #tpu.memory_space<vmem>>, %arg2: memref<16x8xbf16, #tpu.memory_space<vmem>>, %arg3: memref<16x1xf32, #tpu.memory_space<vmem>>, %arg4: memref<48x16xbf16, #tpu.memory_space<vmem>>, %arg5: memref<48x1xf32, #tpu.memory_space<vmem>>, %arg6: memref<16x16xbf16, #tpu.memory_space<vmem>>, %arg7: memref<16x1xf32, #tpu.memory_space<vmem>>, %arg8: memref<2x16x8xbf16, #tpu.memory_space<vmem>>) attributes {dimension_semantics = [#tpu.dimension_semantics<arbitrary>], iteration_bounds = array<i64: 1>, scalar_prefetch = 0 : i64, scratch_operands = 0 : i64, tpu.core_type = #tpu.core_type<tc>, window_params = [{pipeline_mode = #tpu.pipeline_mode<synchronous>, transform_indices = @transform_0, window_bounds = array<i64: 2, 8, 8>}, {pipeline_mode = #tpu.pipeline_mode<synchronous>, transform_indices = @transform_1, window_bounds = array<i64: 16, 8>}, {pipeline_mode = #tpu.pipeline_mode<synchronous>, transform_indices = @transform_2, window_bounds = array<i64: 16, 1>}, {pipeline_mode = #tpu.pipeline_mode<synchronous>, transform_indices = @transform_3, window_bounds = array<i64: 48, 16>}, {pipeline_mode = #tpu.pipeline_mode<synchronous>, transform_indices = @transform_4, window_bounds = array<i64: 48, 1>}, {pipeline_mode = #tpu.pipeline_mode<synchronous>, transform_indices = @transform_5, window_bounds = array<i64: 16, 16>}, {pipeline_mode = #tpu.pipeline_mode<synchronous>, transform_indices = @transform_6, window_bounds = array<i64: 16, 1>}, {pipeline_mode = #tpu.pipeline_mode<synchronous>, transform_indices = @transform_7, window_bounds = array<i64: 2, 16, 8>}]} {
    %c0 = arith.constant 0 : index
    %c0_0 = arith.constant 0 : index
    %0 = vector.load %arg2[%c0, %c0_0] : memref<16x8xbf16, #tpu.memory_space<vmem>>, vector<16x8xbf16>
    %c0_1 = arith.constant 0 : index
    %c0_2 = arith.constant 0 : index
    %1 = vector.load %arg4[%c0_1, %c0_2] : memref<48x16xbf16, #tpu.memory_space<vmem>>, vector<48x16xbf16>
    %c0_3 = arith.constant 0 : index
    %c0_4 = arith.constant 0 : index
    %2 = vector.load %arg6[%c0_3, %c0_4] : memref<16x16xbf16, #tpu.memory_space<vmem>>, vector<16x16xbf16>
    %c0_5 = arith.constant 0 : index
    %c0_6 = arith.constant 0 : index
    %3 = vector.load %arg3[%c0_5, %c0_6] : memref<16x1xf32, #tpu.memory_space<vmem>>, vector<16x1xf32>
    %c0_7 = arith.constant 0 : index
    %c0_8 = arith.constant 0 : index
    %4 = vector.load %arg5[%c0_7, %c0_8] : memref<48x1xf32, #tpu.memory_space<vmem>>, vector<48x1xf32>
    %c0_9 = arith.constant 0 : index
    %c0_10 = arith.constant 0 : index
    %5 = vector.load %arg7[%c0_9, %c0_10] : memref<16x1xf32, #tpu.memory_space<vmem>>, vector<16x1xf32>
    %c0_11 = arith.constant 0 : index
    %c0_12 = arith.constant 0 : index
    %c0_13 = arith.constant 0 : index
    %6 = vector.load %arg1[%c0_11, %c0_12, %c0_13] : memref<2x8x8xbf16, #tpu.memory_space<vmem>>, vector<1x8x8xbf16>
    %7 = vector.shape_cast %6 : vector<1x8x8xbf16> to vector<8x8xbf16>
    %c1 = arith.constant 1 : index
    %c0_14 = arith.constant 0 : index
    %c0_15 = arith.constant 0 : index
    %8 = vector.load %arg1[%c1, %c0_14, %c0_15] : memref<2x8x8xbf16, #tpu.memory_space<vmem>>, vector<1x8x8xbf16>
    %9 = vector.shape_cast %8 : vector<1x8x8xbf16> to vector<8x8xbf16>
    %10 = tpu.concatenate %7, %9 in 1 : vector<8x8xbf16>, vector<8x8xbf16> -> vector<8x16xbf16>
    %cst = arith.constant dense<0.000000e+00> : vector<16x16xf32>
    %11 = tpu.matmul %0, %10, %cst {dimension_numbers = #tpu.dot_dimension_numbers<[1], [0], [0], [1], [0, 0, 1, 1], [], []>} : vector<16x8xbf16>, vector<8x16xbf16>, vector<16x16xf32> -> vector<16x16xf32>
    %12 = vector.broadcast %3 : vector<16x1xf32> to vector<16x16xf32>
    %13 = arith.addf %11, %12 : vector<16x16xf32>
    %14 = arith.truncf %13 : vector<16x16xf32> to vector<16x16xbf16>
    %cst_16 = arith.constant dense<0.000000e+00> : vector<48x16xf32>
    %15 = tpu.matmul %1, %14, %cst_16 {dimension_numbers = #tpu.dot_dimension_numbers<[1], [0], [0], [1], [0, 0, 1, 1], [], []>} : vector<48x16xbf16>, vector<16x16xbf16>, vector<48x16xf32> -> vector<48x16xf32>
    %16 = vector.broadcast %4 : vector<48x1xf32> to vector<48x16xf32>
    %17 = arith.addf %15, %16 : vector<48x16xf32>
    %18 = arith.truncf %17 : vector<48x16xf32> to vector<48x16xbf16>
    %19 = vector.extract_strided_slice %18 {offsets = [0, 0], sizes = [8, 8], strides = [1, 1]} : vector<48x16xbf16> to vector<8x8xbf16>
    %20 = vector.extract_strided_slice %18 {offsets = [16, 0], sizes = [8, 8], strides = [1, 1]} : vector<48x16xbf16> to vector<8x8xbf16>
    %21 = vector.extract_strided_slice %18 {offsets = [32, 0], sizes = [8, 8], strides = [1, 1]} : vector<48x16xbf16> to vector<8x8xbf16>
    %cst_17 = arith.constant dense<0.000000e+00> : vector<8x8xf32>
    %22 = tpu.matmul %19, %20, %cst_17 {dimension_numbers = #tpu.dot_dimension_numbers<[0], [0], [1], [1], [0, 1, 1, 1], [], []>} : vector<8x8xbf16>, vector<8x8xbf16>, vector<8x8xf32> -> vector<8x8xf32>
    %cst_18 = arith.constant 0.353553385 : f32
    %23 = vector.broadcast %cst_18 : f32 to vector<8x8xf32>
    %24 = arith.mulf %22, %23 : vector<8x8xf32>
    %cst_19 = arith.constant dense<0xFF800000> : vector<8xf32>
    %25 = vector.multi_reduction <maximumf>, %24, %cst_19 [1] : vector<8x8xf32> to vector<8xf32>
    %26 = vector.shape_cast %25 : vector<8xf32> to vector<8x1xf32>
    %27 = vector.broadcast %26 : vector<8x1xf32> to vector<8x8xf32>
    %28 = arith.subf %24, %27 : vector<8x8xf32>
    %29 = math.exp %28 : vector<8x8xf32>
    %cst_20 = arith.constant dense<0.000000e+00> : vector<8xf32>
    %30 = vector.multi_reduction <add>, %29, %cst_20 [1] : vector<8x8xf32> to vector<8xf32>
    %31 = vector.shape_cast %30 : vector<8xf32> to vector<8x1xf32>
    %32 = tpu.reciprocal %31 {approx = true} : vector<8x1xf32> -> vector<8x1xf32>
    %33 = vector.broadcast %32 : vector<8x1xf32> to vector<8x8xf32>
    %34 = arith.mulf %29, %33 : vector<8x8xf32>
    %35 = arith.truncf %34 : vector<8x8xf32> to vector<8x8xbf16>
    %cst_21 = arith.constant dense<0.000000e+00> : vector<8x8xf32>
    %36 = tpu.matmul %21, %35, %cst_21 {dimension_numbers = #tpu.dot_dimension_numbers<[1], [1], [0], [0], [0, 0, 1, 0], [], []>} : vector<8x8xbf16>, vector<8x8xbf16>, vector<8x8xf32> -> vector<8x8xf32>
    %37 = vector.extract_strided_slice %18 {offsets = [0, 8], sizes = [8, 8], strides = [1, 1]} : vector<48x16xbf16> to vector<8x8xbf16>
    %38 = vector.extract_strided_slice %18 {offsets = [16, 8], sizes = [8, 8], strides = [1, 1]} : vector<48x16xbf16> to vector<8x8xbf16>
    %39 = vector.extract_strided_slice %18 {offsets = [32, 8], sizes = [8, 8], strides = [1, 1]} : vector<48x16xbf16> to vector<8x8xbf16>
    %cst_22 = arith.constant dense<0.000000e+00> : vector<8x8xf32>
    %40 = tpu.matmul %37, %38, %cst_22 {dimension_numbers = #tpu.dot_dimension_numbers<[0], [0], [1], [1], [0, 1, 1, 1], [], []>} : vector<8x8xbf16>, vector<8x8xbf16>, vector<8x8xf32> -> vector<8x8xf32>
    %cst_23 = arith.constant 0.353553385 : f32
    %41 = vector.broadcast %cst_23 : f32 to vector<8x8xf32>
    %42 = arith.mulf %40, %41 : vector<8x8xf32>
    %cst_24 = arith.constant dense<0xFF800000> : vector<8xf32>
    %43 = vector.multi_reduction <maximumf>, %42, %cst_24 [1] : vector<8x8xf32> to vector<8xf32>
    %44 = vector.shape_cast %43 : vector<8xf32> to vector<8x1xf32>
    %45 = vector.broadcast %44 : vector<8x1xf32> to vector<8x8xf32>
    %46 = arith.subf %42, %45 : vector<8x8xf32>
    %47 = math.exp %46 : vector<8x8xf32>
    %cst_25 = arith.constant dense<0.000000e+00> : vector<8xf32>
    %48 = vector.multi_reduction <add>, %47, %cst_25 [1] : vector<8x8xf32> to vector<8xf32>
    %49 = vector.shape_cast %48 : vector<8xf32> to vector<8x1xf32>
    %50 = tpu.reciprocal %49 {approx = true} : vector<8x1xf32> -> vector<8x1xf32>
    %51 = vector.broadcast %50 : vector<8x1xf32> to vector<8x8xf32>
    %52 = arith.mulf %47, %51 : vector<8x8xf32>
    %53 = arith.truncf %52 : vector<8x8xf32> to vector<8x8xbf16>
    %cst_26 = arith.constant dense<0.000000e+00> : vector<8x8xf32>
    %54 = tpu.matmul %39, %53, %cst_26 {dimension_numbers = #tpu.dot_dimension_numbers<[1], [1], [0], [0], [0, 0, 1, 0], [], []>} : vector<8x8xbf16>, vector<8x8xbf16>, vector<8x8xf32> -> vector<8x8xf32>
    %55 = tpu.concatenate %36, %54 in 1 : vector<8x8xf32>, vector<8x8xf32> -> vector<8x16xf32>
    %56 = vector.extract_strided_slice %18 {offsets = [8, 0], sizes = [8, 8], strides = [1, 1]} : vector<48x16xbf16> to vector<8x8xbf16>
    %57 = vector.extract_strided_slice %18 {offsets = [24, 0], sizes = [8, 8], strides = [1, 1]} : vector<48x16xbf16> to vector<8x8xbf16>
    %58 = vector.extract_strided_slice %18 {offsets = [40, 0], sizes = [8, 8], strides = [1, 1]} : vector<48x16xbf16> to vector<8x8xbf16>
    %cst_27 = arith.constant dense<0.000000e+00> : vector<8x8xf32>
    %59 = tpu.matmul %56, %57, %cst_27 {dimension_numbers = #tpu.dot_dimension_numbers<[0], [0], [1], [1], [0, 1, 1, 1], [], []>} : vector<8x8xbf16>, vector<8x8xbf16>, vector<8x8xf32> -> vector<8x8xf32>
    %cst_28 = arith.constant 0.353553385 : f32
    %60 = vector.broadcast %cst_28 : f32 to vector<8x8xf32>
    %61 = arith.mulf %59, %60 : vector<8x8xf32>
    %cst_29 = arith.constant dense<0xFF800000> : vector<8xf32>
    %62 = vector.multi_reduction <maximumf>, %61, %cst_29 [1] : vector<8x8xf32> to vector<8xf32>
    %63 = vector.shape_cast %62 : vector<8xf32> to vector<8x1xf32>
    %64 = vector.broadcast %63 : vector<8x1xf32> to vector<8x8xf32>
    %65 = arith.subf %61, %64 : vector<8x8xf32>
    %66 = math.exp %65 : vector<8x8xf32>
    %cst_30 = arith.constant dense<0.000000e+00> : vector<8xf32>
    %67 = vector.multi_reduction <add>, %66, %cst_30 [1] : vector<8x8xf32> to vector<8xf32>
    %68 = vector.shape_cast %67 : vector<8xf32> to vector<8x1xf32>
    %69 = tpu.reciprocal %68 {approx = true} : vector<8x1xf32> -> vector<8x1xf32>
    %70 = vector.broadcast %69 : vector<8x1xf32> to vector<8x8xf32>
    %71 = arith.mulf %66, %70 : vector<8x8xf32>
    %72 = arith.truncf %71 : vector<8x8xf32> to vector<8x8xbf16>
    %cst_31 = arith.constant dense<0.000000e+00> : vector<8x8xf32>
    %73 = tpu.matmul %58, %72, %cst_31 {dimension_numbers = #tpu.dot_dimension_numbers<[1], [1], [0], [0], [0, 0, 1, 0], [], []>} : vector<8x8xbf16>, vector<8x8xbf16>, vector<8x8xf32> -> vector<8x8xf32>
    %74 = vector.extract_strided_slice %18 {offsets = [8, 8], sizes = [8, 8], strides = [1, 1]} : vector<48x16xbf16> to vector<8x8xbf16>
    %75 = vector.extract_strided_slice %18 {offsets = [24, 8], sizes = [8, 8], strides = [1, 1]} : vector<48x16xbf16> to vector<8x8xbf16>
    %76 = vector.extract_strided_slice %18 {offsets = [40, 8], sizes = [8, 8], strides = [1, 1]} : vector<48x16xbf16> to vector<8x8xbf16>
    %cst_32 = arith.constant dense<0.000000e+00> : vector<8x8xf32>
    %77 = tpu.matmul %74, %75, %cst_32 {dimension_numbers = #tpu.dot_dimension_numbers<[0], [0], [1], [1], [0, 1, 1, 1], [], []>} : vector<8x8xbf16>, vector<8x8xbf16>, vector<8x8xf32> -> vector<8x8xf32>
    %cst_33 = arith.constant 0.353553385 : f32
    %78 = vector.broadcast %cst_33 : f32 to vector<8x8xf32>
    %79 = arith.mulf %77, %78 : vector<8x8xf32>
    %cst_34 = arith.constant dense<0xFF800000> : vector<8xf32>
    %80 = vector.multi_reduction <maximumf>, %79, %cst_34 [1] : vector<8x8xf32> to vector<8xf32>
    %81 = vector.shape_cast %80 : vector<8xf32> to vector<8x1xf32>
    %82 = vector.broadcast %81 : vector<8x1xf32> to vector<8x8xf32>
    %83 = arith.subf %79, %82 : vector<8x8xf32>
    %84 = math.exp %83 : vector<8x8xf32>
    %cst_35 = arith.constant dense<0.000000e+00> : vector<8xf32>
    %85 = vector.multi_reduction <add>, %84, %cst_35 [1] : vector<8x8xf32> to vector<8xf32>
    %86 = vector.shape_cast %85 : vector<8xf32> to vector<8x1xf32>
    %87 = tpu.reciprocal %86 {approx = true} : vector<8x1xf32> -> vector<8x1xf32>
    %88 = vector.broadcast %87 : vector<8x1xf32> to vector<8x8xf32>
    %89 = arith.mulf %84, %88 : vector<8x8xf32>
    %90 = arith.truncf %89 : vector<8x8xf32> to vector<8x8xbf16>
    %cst_36 = arith.constant dense<0.000000e+00> : vector<8x8xf32>
    %91 = tpu.matmul %76, %90, %cst_36 {dimension_numbers = #tpu.dot_dimension_numbers<[1], [1], [0], [0], [0, 0, 1, 0], [], []>} : vector<8x8xbf16>, vector<8x8xbf16>, vector<8x8xf32> -> vector<8x8xf32>
    %92 = tpu.concatenate %73, %91 in 1 : vector<8x8xf32>, vector<8x8xf32> -> vector<8x16xf32>
    %93 = tpu.concatenate %55, %92 in 0 : vector<8x16xf32>, vector<8x16xf32> -> vector<16x16xf32>
    %94 = arith.truncf %93 : vector<16x16xf32> to vector<16x16xbf16>
    %cst_37 = arith.constant dense<0.000000e+00> : vector<16x16xf32>
    %95 = tpu.matmul %2, %94, %cst_37 {dimension_numbers = #tpu.dot_dimension_numbers<[1], [0], [0], [1], [0, 0, 1, 1], [], []>} : vector<16x16xbf16>, vector<16x16xbf16>, vector<16x16xf32> -> vector<16x16xf32>
    %96 = vector.broadcast %5 : vector<16x1xf32> to vector<16x16xf32>
    %97 = arith.addf %95, %96 : vector<16x16xf32>
    %98 = vector.extract_strided_slice %97 {offsets = [0, 0], sizes = [16, 8], strides = [1, 1]} : vector<16x16xf32> to vector<16x8xf32>
    %99 = arith.truncf %98 : vector<16x8xf32> to vector<16x8xbf16>
    %c0_38 = arith.constant 0 : index
    %c0_39 = arith.constant 0 : index
    %c0_40 = arith.constant 0 : index
    %100 = vector.load %arg8[%c0_38, %c0_39, %c0_40] : memref<2x16x8xbf16, #tpu.memory_space<vmem>>, vector<1x16x8xbf16>
    %101 = vector.shape_cast %100 : vector<1x16x8xbf16> to vector<16x8xbf16>
    %102 = vector.shape_cast %99 : vector<16x8xbf16> to vector<1x16x8xbf16>
    tpu.vector_store %arg8[%c0_38, %c0_39, %c0_40], %102 {strides = array<i32>} : memref<2x16x8xbf16, #tpu.memory_space<vmem>>, vector<1x16x8xbf16>,
    %103 = vector.extract_strided_slice %97 {offsets = [0, 8], sizes = [16, 8], strides = [1, 1]} : vector<16x16xf32> to vector<16x8xf32>
    %104 = arith.truncf %103 : vector<16x8xf32> to vector<16x8xbf16>
    %c1_41 = arith.constant 1 : index
    %c0_42 = arith.constant 0 : index
    %c0_43 = arith.constant 0 : index
    %105 = vector.load %arg8[%c1_41, %c0_42, %c0_43] : memref<2x16x8xbf16, #tpu.memory_space<vmem>>, vector<1x16x8xbf16>
    %106 = vector.shape_cast %105 : vector<1x16x8xbf16> to vector<16x8xbf16>
    %107 = vector.shape_cast %104 : vector<16x8xbf16> to vector<1x16x8xbf16>
    tpu.vector_store %arg8[%c1_41, %c0_42, %c0_43], %107 {strides = array<i32>} : memref<2x16x8xbf16, #tpu.memory_space<vmem>>, vector<1x16x8xbf16>,
    return
  }
  func.func @transform_0(%arg0: i32) -> (i32, i32, i32) {
    %c0_i32 = arith.constant 0 : i32
    %c0_i32_0 = arith.constant 0 : i32
    %c0_i32_1 = arith.constant 0 : i32
    %c0_i32_2 = arith.constant 0 : i32
    return %c0_i32, %c0_i32_0, %c0_i32_1 : i32, i32, i32
  }
  func.func @transform_1(%arg0: i32) -> (i32, i32) {
    %c0_i32 = arith.constant 0 : i32
    %c0_i32_0 = arith.constant 0 : i32
    %c0_i32_1 = arith.constant 0 : i32
    return %c0_i32, %c0_i32_0 : i32, i32
  }
  func.func @transform_2(%arg0: i32) -> (i32, i32) {
    %c0_i32 = arith.constant 0 : i32
    %c0_i32_0 = arith.constant 0 : i32
    %c0_i32_1 = arith.constant 0 : i32
    return %c0_i32, %c0_i32_0 : i32, i32
  }
  func.func @transform_3(%arg0: i32) -> (i32, i32) {
    %c0_i32 = arith.constant 0 : i32
    %c0_i32_0 = arith.constant 0 : i32
    %c0_i32_1 = arith.constant 0 : i32
    return %c0_i32, %c0_i32_0 : i32, i32
  }
  func.func @transform_4(%arg0: i32) -> (i32, i32) {
    %c0_i32 = arith.constant 0 : i32
    %c0_i32_0 = arith.constant 0 : i32
    %c0_i32_1 = arith.constant 0 : i32
    return %c0_i32, %c0_i32_0 : i32, i32
  }
  func.func @transform_5(%arg0: i32) -> (i32, i32) {
    %c0_i32 = arith.constant 0 : i32
    %c0_i32_0 = arith.constant 0 : i32
    %c0_i32_1 = arith.constant 0 : i32
    return %c0_i32, %c0_i32_0 : i32, i32
  }
  func.func @transform_6(%arg0: i32) -> (i32, i32) {
    %c0_i32 = arith.constant 0 : i32
    %c0_i32_0 = arith.constant 0 : i32
    %c0_i32_1 = arith.constant 0 : i32
    return %c0_i32, %c0_i32_0 : i32, i32
  }
  func.func @transform_7(%arg0: i32) -> (i32, i32, i32) {
    %c0_i32 = arith.constant 0 : i32
    %c0_i32_0 = arith.constant 0 : i32
    %c0_i32_1 = arith.constant 0 : i32
    %c0_i32_2 = arith.constant 0 : i32
    return %c0_i32, %c0_i32_0, %c0_i32_1 : i32, i32, i32
  }
}

</mosaic_0001>

<bundles_post_ra>
// kernel: tpu_custom_call.1
= control target key start
LH: loop header
LB: loop body
LE: loop exit
PB: predicated region body
PF: predicated region fallthrough
CT: control target
= control target key end

     0   :  { %v994_v1 = vmov 0.0   ;;  %vm995_vm0 = vmmov 0   ;;  %s996_s26 = smov 8   ;;  %v997_v2 = vmov 0   ;;  %vm55_vm1 = vcmask 64512   ;;  %s1195_s0 = inlined_call_operand.vmem [shape: bf16[2,8,8], index: 0, kind: input, shape index: {}]   ;;  %s1196_s2 = inlined_call_operand.vmem [shape: f32[16,1], index: 2, kind: input, shape index: {}]   ;;  %s1197_s1 = inlined_call_operand.vmem [shape: bf16[16,8], index: 1, kind: input, shape index: {}]   ;;  %s1198_s4 = inlined_call_operand.vmem [shape: f32[48,1], index: 4, kind: input, shape index: {}]   ;;  %s1199_s3 = inlined_call_operand.vmem [shape: bf16[48,16], index: 3, kind: input, shape index: {}]   ;;  %s1200_s6 = inlined_call_operand.vmem [shape: f32[16,1], index: 6, kind: input, shape index: {}]   ;;  %s1201_s5 = inlined_call_operand.vmem [shape: bf16[16,16], index: 5, kind: input, shape index: {}]   ;;  %s1202_s7 = inlined_call_operand.vmem [shape: bf16[2,16,8], index: 7, kind: output, shape index: {}]  }
   0x1   :  { %v972_v0 = vld [vmem:[%s1195_s0 + $0x4] ss:$0 sps:$4 sm:$0xff]   ;;  %886 = vmatprep.subr.bf16.mxu0 %v994_v1  ;;  %888 = vmatprep.mubr.msk.bf16.mxu0 %vm995_vm0, %v994_v1  ;;  %v38_v3 = vld [vmem:[%s1196_s2 + $0x8] sm:$0xff]  ;;  %v41_v6 = vld [vmem:[%s1198_s4 + $0x10] sm:$0xff]  ;;  %vm77_vm2 = vcmask 1043456   ;;  %vm167_vm3 = vcmask 130048  }
   0x2   :  { %892 = vmatprep.subr.bf16.mxu1 %v994_v1  ;;  %894 = vmatprep.mubr.msk.bf16.mxu1 %vm995_vm0, %v994_v1  ;;  %v37_v4 = vld [vmem:[%s1196_s2] sm:$0xff]  ;;  %v40_v7 = vld [vmem:[%s1198_s4 + $0x8] sm:$0xff]  ;;  %v42_v8 = vld [vmem:[%s1198_s4 + $0x18] sm:$0xff]  ;;  %vm820_vm4 = vcmask 60416  }
   0x3   :  { %53 = vrot.lane.b32.xlu0 %v972_v0, %s996_s26  ;;  %966 = vset.pattern.permute.xlu1 %v997_v2  ;;  %v39_v5 = vld [vmem:[%s1198_s4] sm:$0xff]  ;;  %v975_v24 = vld [vmem:[%s1199_s3 + $0x8] sm:$0xff]   ;;  %v976_v25 = vld [vmem:[%s1199_s3 + $0x10] sm:$0xff]  }
   0x4   :  { %66 = vperm.xlu1 %966, %v38_v3   ;;  %965 = vset.pattern.permute.xlu0 %v997_v2  ;;  %v47_v9 = vld [vmem:[%s1195_s0] sm:$0xf]  ;;  %v44_v57 = vld [vmem:[%s1198_s4 + $0x28] sm:$0xff] }
   0x5   :  { %v973_v13 = vld [vmem:[%s1197_s1] sm:$0xff]  }
   0x6   :  { %v974_v23 = vld [vmem:[%s1199_s3] sm:$0xff]   ;;  %s998_s3 = smov 120  }
   0x7   :  { %61 = vperm.xlu0 %965, %v37_v4   ;;  %v43_v54 = vld [vmem:[%s1198_s4 + $0x20] sm:$0xff] }
   0x8   :  { %124 = vperm.xlu1 %966, %v39_v5  }
   0xb   :  { %134 = vperm.xlu0 %965, %v41_v6  }
   0xc   :  { %129 = vperm.xlu1 %966, %v40_v7  }
  0x10   :  { %139 = vperm.xlu1 %966, %v42_v8  }
  0x75   :  { %v54_v10 = vpop.permute.xlu0 %53 }
  0x76   :  { %v58_v11 = vsel %vm55_vm1, %v47_v9, %v54_v10 }
  0x77   :  { %v78_v12 = vsel %vm77_vm2, %v58_v11, 0 }
  0x78   :  { %887 = vmatpush3.bf16.msra.mxu0 %v78_v12 }
  0x79   :  { %906 = vmatprep.subr.bf16.mxu0 %v994_v1 }
  0x7b   :  { %889 = vmatmul.mubr.msk.bf16.vlgmr.msra.gmra.mxu0 %vm55_vm1, %v973_v13 }
  0x7c   :  { %908 = vmatprep.mubr.msk.bf16.mxu0 %vm995_vm0, %v994_v1 }
  0x7f   :  { %v67_v17 = vpop.permute.xlu1 %66 }
  0x82   :  { %v62_v15 = vpop.permute.xlu0 %61 }
  0x83   :  { %v125_v26 = vpop.permute.xlu1 %124 }
  0x86   :  { %v135_v38 = vpop.permute.xlu0 %134 }
  0x87   :  { %v130_v29 = vpop.permute.xlu1 %129 }
  0x8b   :  { %v140_v37 = vpop.permute.xlu1 %139 }
 0x13b   :  { %v114_v14 = vpop.f32.mrf.mxu0 }
 0x13c   :  { %v115_v19 = vadd.f32 %v114_v14, %v62_v15 }
 0x13d   :  { %v890_v16 = vpop.f32.mrf.mxu0 }
 0x13f   :  { %v117_v18 = vpop.f32.mrf.mxu0 }
 0x140   :  { %v118_v20 = vadd.f32 %v117_v18, %v67_v17 }
 0x141   :  { %v891_v21 = vpop.f32.mrf.mxu0 }
 0x142   :  { %v121_v22 = vpack.c.bf16 %v118_v20, %v115_v19 }
 0x144   :  { %893 = vmatpush3.bf16.msra.mxu1 %v121_v22 }
 0x145   :  { %924 = vmatprep.subr.bf16.mxu1 %v994_v1 }
 0x147   :  { %895 = vmatmul.mubr.msk.bf16.vlgmr.msra.gmra.mxu1 %vm167_vm3, %v974_v23 }
 0x148   :  { %898 = vmatprep.mubr.msk.bf16.mxu1 %vm995_vm0, %v994_v1 }
 0x14f   :  { %899 = vmatmul.mubr.msk.bf16.gmra.mxu1 %vm167_vm3, %v975_v24 }
 0x150   :  { %902 = vmatprep.mubr.msk.bf16.mxu1 %vm995_vm0, %v994_v1 }
 0x157   :  { %903 = vmatmul.mubr.msk.bf16.gmra.mxu1 %vm167_vm3, %v976_v25 }
 0x158   :  { %926 = vmatprep.mubr.msk.bf16.mxu1 %vm995_vm0, %v994_v1 }
 0x207   :  { %v211_v27 = vpop.f32.mrf.mxu1 }
 0x208   :  { %v212_v31 = vadd.f32 %v211_v27, %v125_v26 }
 0x209   :  { %v896_v28 = vpop.f32.mrf.mxu1 }
 0x20b   :  { %v214_v30 = vpop.f32.mrf.mxu1 }
 0x20c   :  { %v215_v32 = vadd.f32 %v214_v30, %v130_v29 }
 0x20d   :  { %v897_v33 = vpop.f32.mrf.mxu1 }
 0x20e   :  { %v234_v34 = vpack.c.bf16 %v215_v32, %v212_v31 }
 0x20f   :  { %v219_v35 = vpop.f32.mrf.mxu1 }
 0x210   :  { %237 = vxpose.xlu0.c.b16.start.end [1/1] (short) (narrow) %v234_v34, 16  ;;  %v220_v40 = vadd.f32 %v219_v35, %v135_v38  ;;  %v494_v0 = vrot.slane %v234_v34, 4 }
 0x211   :  { %v900_v36 = vpop.f32.mrf.mxu1 }
 0x213   :  { %v222_v39 = vpop.f32.mrf.mxu1 }
 0x214   :  { %v223_v41 = vadd.f32 %v222_v39, %v140_v37 }
 0x215   :  { %v901_v42 = vpop.f32.mrf.mxu1 }
 0x216   :  { %v1098_v43 = vpack.c.bf16 %v223_v41, %v220_v40 }
 0x217   :  { %v227_v52 = vpop.f32.mrf.mxu1 }
 0x218   :  { %v257_v44 = vsel %vm77_vm2, %v1098_v43, 0  ;;  %v512_v2 = vrot.slane %v1098_v43, 4 }
 0x219   :  { %907 = vmatpush3.bf16.msra.mxu0 %v257_v44  ;;  %v904_v53 = vpop.f32.mrf.mxu1 }
 0x21a   :  { %912 = vmatprep.subr.bf16.mxu0 %v994_v1  ;;  %v517_v17 = vsel %vm77_vm2, %v512_v2, 0 }
 0x21b   :  { %v230_v55 = vpop.f32.mrf.mxu1 }
 0x21d   :  { %v905_v56 = vpop.f32.mrf.mxu1 }
 0x272   :  { %v245_v45 = vpop.trf.xlu0 }
 0x273   :  { %909 = vmatmul.mubr.msk.bf16.vlgmr.msra.gmra.mxu0 %vm55_vm1, %v245_v45 }
 0x274   :  { %914 = vmatprep.mubr.msk.bf16.mxu0 %vm995_vm0, %v994_v1 }
 0x333   :  { %v293_v46 = vpop.f32.mrf.mxu0 }
 0x334   :  { %v299_v47 = vmul.f32 0.35355338, %v293_v46 }
 0x335   :  { %v910_v48 = vpop.f32.mrf.mxu0 }
 0x336   :  { %v300_v49 = vsel %vm55_vm1, %v299_v47, -inf }
 0x337   :  { %301 = vmax.xlane.f32.xlu1 %v300_v49  ;;  %v296_v50 = vpop.f32.mrf.mxu0 }
 0x339   :  { %v911_v51 = vpop.f32.mrf.mxu0 }
 0x348   :  { %359 = vrot.lane.b32.xlu1 %v234_v34, %s998_s3 }
 0x34c   :  { %144 = vperm.xlu1 %966, %v43_v54  }
 0x350   :  { %149 = vperm.xlu1 %966, %v44_v57  }
 0x354   :  { %379 = vrot.lane.b32.xlu1 %v1098_v43, %s998_s3 }
 0x3c0   :  { %v302_v58 = vpop.xlane.xlu1 %301 }
 0x3c1   :  { %v303_v59 = vsub.f32 %v299_v47, %v302_v58 }
 0x3c3   :  { %v304_v60 = vmul.f32 1.442695, %v303_v59 }
 0x3c4   :  { %v360_v61 = vpop.permute.xlu1 %359 }
 0x3c5   :  { %978 = vpow2.f32 %v304_v60  ;;  %362 = vxpose.xlu1.c.b16.start.end [1/1] (short) (narrow) %v360_v61, 16  ;;  %v46_v60 = vld [vmem:[%s1200_s6 + $0x8] sm:$0xff] }
 0x3c8   :  { %v145_v5 = vpop.permute.xlu1 %144 }
 0x3c9   :  { %v228_v12 = vadd.f32 %v227_v52, %v145_v5 }
 0x3cc   :  { %v150_v9 = vpop.permute.xlu1 %149 }
 0x3cd   :  { %v231_v11 = vadd.f32 %v230_v55, %v150_v9 }
 0x3cf   :  { %v1122_v14 = vpack.c.bf16 %v231_v11, %v228_v12 }
 0x3d0   :  { %v380_v13 = vpop.permute.xlu1 %379 }
 0x3d1   :  { %v385_v15 = vsel %vm77_vm2, %v380_v13, 0  ;;  %v572_v59 = vrot.slane %v1122_v14, 4 }
 0x3d2   :  { %v979_v62 = vpop.eup %978 }
 0x3d3   :  { %v306_v63 = vsel %vm55_vm1, %v979_v62, 0.0 }
 0x3d4   :  { %307 = vadd.xlane.f32.xlu0 %v306_v63 }
 0x3ea   :  { %619 = vrot.lane.b32.xlu0 %v494_v0, %s998_s3 }
 0x3ee   :  { %638 = vrot.lane.b32.xlu0 %v512_v2, %s998_s3 }
 0x40c   :  { %496 = vxpose.xlu0.c.b16.start.end [1/1] (short) (narrow) %v494_v0, 16 }
 0x427   :  { %v370_v16 = vpop.trf.xlu1 }
 0x45d   :  { %v308_v3 = vpop.xlane.xlu0 %307 }
 0x45e   :  { %980 = vrcp.f32 %v308_v3 }
 0x461   :  { %v620_v4 = vpop.permute.xlu0 %619 }
 0x462   :  { %622 = vxpose.xlu0.c.b16.start.end [1/1] (short) (narrow) %v620_v4, 16 }
 0x465   :  { %v639_v18 = vpop.permute.xlu0 %638 }
 0x466   :  { %v644_v20 = vsel %vm77_vm2, %v639_v18, 0 }
 0x46b   :  { %v981_v6 = vpop.eup %980 }
 0x46c   :  { %v310_v7 = vmul.f32 %v981_v6, %v979_v62 }
 0x46e   :  { %v311_v8 = vpack.c.bf16 %v310_v7, %v310_v7  ;;  %v504_v19 = vpop.trf.xlu0 }
 0x470   :  { %v316_v10 = vsel %vm55_vm1, %v311_v8, 0 }
 0x471   :  { %913 = vmatpush3.bf16.xpose.msra.mxu0 %v316_v10 }
 0x472   :  { %918 = vmatprep.subr.bf16.mxu0 %v994_v1 }
 0x478   :  { %915 = vmatmul.mubr.msk.bf16.vlgmr.msra.gmra.mxu0 %vm55_vm1, %v1122_v14 }
 0x479   :  { %919 = vmatpush3.bf16.msra.mxu0 %v385_v15  ;;  %920 = vmatprep.mubr.msk.bf16.mxu0 %vm995_vm0, %v994_v1 }
 0x47a   :  { %930 = vmatprep.subr.bf16.mxu0 %v994_v1 }
 0x480   :  { %921 = vmatmul.mubr.msk.bf16.vlgmr.msra.gmra.mxu0 %vm55_vm1, %v370_v16 }
 0x481   :  { %931 = vmatpush3.bf16.msra.mxu0 %v517_v17  ;;  %932 = vmatprep.mubr.msk.bf16.mxu0 %vm995_vm0, %v994_v1 }
 0x482   :  { %942 = vmatprep.subr.bf16.mxu0 %v994_v1 }
 0x488   :  { %933 = vmatmul.mubr.msk.bf16.vlgmr.msra.gmra.mxu0 %vm55_vm1, %v504_v19 }
 0x489   :  { %943 = vmatpush3.bf16.msra.mxu0 %v644_v20  ;;  %944 = vmatprep.mubr.msk.bf16.mxu0 %vm995_vm0, %v994_v1 }
 0x48a   :  { %954 = vmatprep.subr.bf16.mxu0 %v994_v1 }
 0x4c4   :  { %v630_v21 = vpop.trf.xlu0 }
 0x4c5   :  { %945 = vmatmul.mubr.msk.bf16.vlgmr.msra.gmra.mxu0 %vm55_vm1, %v630_v21 }
 0x4c6   :  { %956 = vmatprep.mubr.msk.bf16.mxu0 %vm995_vm0, %v994_v1 }
 0x538   :  { %v1143_v22 = vpop.f32.mrf.mxu0 }
 0x53a   :  { %v916_v23 = vpop.f32.mrf.mxu0 }
 0x53c   :  { %v355_v24 = vpop.f32.mrf.mxu0 }
 0x53e   :  { %v917_v25 = vpop.f32.mrf.mxu0 }
 0x540   :  { %v421_v26 = vpop.f32.mrf.mxu0 }
 0x541   :  { %v427_v27 = vmul.f32 0.35355338, %v421_v26 }
 0x542   :  { %v922_v28 = vpop.f32.mrf.mxu0 }
 0x543   :  { %v428_v29 = vsel %vm55_vm1, %v427_v27, -inf }
 0x544   :  { %429 = vmax.xlane.f32.xlu1 %v428_v29  ;;  %v424_v30 = vpop.f32.mrf.mxu0 }
 0x546   :  { %v923_v31 = vpop.f32.mrf.mxu0 }
 0x548   :  { %v553_v32 = vpop.f32.mrf.mxu0 }
 0x549   :  { %v559_v33 = vmul.f32 0.35355338, %v553_v32 }
 0x54a   :  { %v934_v34 = vpop.f32.mrf.mxu0 }
 0x54b   :  { %v560_v35 = vsel %vm55_vm1, %v559_v33, -inf }
 0x54c   :  { %561 = vmax.xlane.f32.xlu0 %v560_v35  ;;  %v556_v36 = vpop.f32.mrf.mxu0  ;;  %v977_v35 = vld [vmem:[%s1201_s5] sm:$0xff]  }
 0x54e   :  { %v935_v37 = vpop.f32.mrf.mxu0 }
 0x585   :  { %v680_v38 = vpop.f32.mrf.mxu0 }
 0x586   :  { %v686_v39 = vmul.f32 0.35355338, %v680_v38 }
 0x587   :  { %v946_v40 = vpop.f32.mrf.mxu0 }
 0x588   :  { %v687_v41 = vsel %vm55_vm1, %v686_v39, -inf }
 0x589   :  { %688 = vmax.xlane.f32.xlu1 %v687_v41  ;;  %v683_v42 = vpop.f32.mrf.mxu0 }
 0x58b   :  { %v947_v43 = vpop.f32.mrf.mxu0 }
 0x5cd   :  { %v430_v44 = vpop.xlane.xlu1 %429 }
 0x5ce   :  { %v431_v45 = vsub.f32 %v427_v27, %v430_v44  ;;  %v45_v27 = vld [vmem:[%s1200_s6] sm:$0xff] }
 0x5d0   :  { %v432_v46 = vmul.f32 1.442695, %v431_v45 }
 0x5d2   :  { %982 = vpow2.f32 %v432_v46 }
 0x5d5   :  { %v562_v47 = vpop.xlane.xlu0 %561 }
 0x5d6   :  { %v563_v48 = vsub.f32 %v559_v33, %v562_v47 }
 0x5d8   :  { %v564_v49 = vmul.f32 1.442695, %v563_v48 }
 0x5da   :  { %984 = vpow2.f32 %v564_v49 }
 0x5df   :  { %v983_v50 = vpop.eup %982 }
 0x5e0   :  { %v434_v51 = vsel %vm55_vm1, %v983_v50, 0.0 }
 0x5e1   :  { %435 = vadd.xlane.f32.xlu0 %v434_v51 }
 0x5e7   :  { %v985_v52 = vpop.eup %984 }
 0x5e8   :  { %v566_v53 = vsel %vm55_vm1, %v985_v52, 0.0 }
 0x5e9   :  { %567 = vadd.xlane.f32.xlu1 %v566_v53 }
 0x5fa   :  { %441 = vrot.lane.b32.xlu1 %v1122_v14, %s998_s3 }
 0x612   :  { %v689_v54 = vpop.xlane.xlu1 %688 }
 0x613   :  { %v690_v55 = vsub.f32 %v686_v39, %v689_v54 }
 0x615   :  { %v691_v56 = vmul.f32 1.442695, %v690_v55 }
 0x617   :  { %986 = vpow2.f32 %v691_v56 }
 0x624   :  { %v987_v57 = vpop.eup %986 }
 0x625   :  { %v693_v58 = vsel %vm55_vm1, %v987_v57, 0.0 }
 0x626   :  { %694 = vadd.xlane.f32.xlu0 %v693_v58 }
 0x63c   :  { %699 = vrot.lane.b32.xlu0 %v572_v59, %s998_s3 }
 0x640   :  { %760 = vperm.xlu0 %965, %v46_v60  }
 0x66a   :  { %v436_v61 = vpop.xlane.xlu0 %435 }
 0x66b   :  { %988 = vrcp.f32 %v436_v61 }
 0x672   :  { %v568_v62 = vpop.xlane.xlu1 %567 }
 0x673   :  { %990 = vrcp.f32 %v568_v62 }
 0x676   :  { %v442_v7 = vpop.permute.xlu1 %441 }
 0x678   :  { %v989_v63 = vpop.eup %988 }
 0x679   :  { %v438_v0 = vmul.f32 %v989_v63, %v983_v50 }
 0x67b   :  { %v439_v2 = vpack.c.bf16 %v438_v0, %v438_v0 }
 0x67d   :  { %v447_v3 = vsel %vm55_vm1, %v439_v2, 0 }
 0x67e   :  { %925 = vmatpush3.bf16.xpose.msra.mxu1 %v447_v3 }
 0x67f   :  { %936 = vmatprep.subr.bf16.mxu1 %v994_v1 }
 0x680   :  { %v991_v4 = vpop.eup %990 }
 0x681   :  { %v570_v5 = vmul.f32 %v991_v4, %v985_v52 }
 0x683   :  { %v571_v6 = vpack.c.bf16 %v570_v5, %v570_v5 }
 0x685   :  { %927 = vmatmul.mubr.msk.bf16.vlgmr.msra.gmra.mxu1 %vm55_vm1, %v442_v7  ;;  %v577_v8 = vsel %vm55_vm1, %v571_v6, 0 }
 0x686   :  { %937 = vmatpush3.bf16.xpose.msra.mxu1 %v577_v8  ;;  %938 = vmatprep.mubr.msk.bf16.mxu1 %vm995_vm0, %v994_v1 }
 0x687   :  { %948 = vmatprep.subr.bf16.mxu1 %v994_v1 }
 0x68d   :  { %939 = vmatmul.mubr.msk.bf16.vlgmr.msra.gmra.mxu1 %vm55_vm1, %v572_v59 }
 0x68e   :  { %950 = vmatprep.mubr.msk.bf16.mxu1 %vm995_vm0, %v994_v1 }
 0x6af   :  { %v695_v9 = vpop.xlane.xlu0 %694 }
 0x6b0   :  { %992 = vrcp.f32 %v695_v9 }
 0x6b3   :  { %v700_v14 = vpop.permute.xlu0 %699 }
 0x6bb   :  { %v761_v41 = vpop.permute.xlu0 %760 }
 0x6bd   :  { %v993_v10 = vpop.eup %992 }
 0x6be   :  { %v697_v11 = vmul.f32 %v993_v10, %v987_v57 }
 0x6c0   :  { %v698_v12 = vpack.c.bf16 %v697_v11, %v697_v11 }
 0x6c2   :  { %v705_v13 = vsel %vm55_vm1, %v698_v12, 0 }
 0x6c3   :  { %949 = vmatpush3.bf16.xpose.msra.mxu1 %v705_v13 }
 0x6ca   :  { %951 = vmatmul.mubr.msk.bf16.vlgmr.msra.gmra.mxu1 %vm55_vm1, %v700_v14 }
 0x745   :  { %v483_v15 = vpop.f32.mrf.mxu1 }
 0x747   :  { %v928_v16 = vpop.f32.mrf.mxu1 }
 0x749   :  { %v486_v17 = vpop.f32.mrf.mxu1 }
 0x74b   :  { %v929_v18 = vpop.f32.mrf.mxu1 }
 0x74d   :  { %v613_v19 = vpop.f32.mrf.mxu1 }
 0x74f   :  { %v940_v20 = vpop.f32.mrf.mxu1 }
 0x751   :  { %v616_v21 = vpop.f32.mrf.mxu1 }
 0x753   :  { %v941_v23 = vpop.f32.mrf.mxu1 }
 0x78a   :  { %v741_v1 = vpop.f32.mrf.mxu1 }
 0x78b   :  { %v967_v24 = vpack.i.bf16 %v741_v1, %v483_v15 }
 0x78c   :  { %v952_v25 = vpop.f32.mrf.mxu1 }
 0x78d   :  { %968 = vrot.lane.b32.xlu1 %v967_v24, %s996_s26 }
 0x78e   :  { %v744_v26 = vpop.f32.mrf.mxu1 }
 0x790   :  { %v953_v28 = vpop.f32.mrf.mxu1 }
 0x791   :  { %755 = vperm.xlu1 %966, %v45_v27  }
 0x7ff   :  { %v969_v29 = vpop.permute.xlu1 %968 }
 0x800   :  { %v971_v30 = vunpack.i.h.bf16 %v969_v29  ;;  %v970_v31 = vunpack.i.l.bf16 %v969_v29 }
 0x802   :  { %v751_v32 = vsel %vm55_vm1, %v613_v19, %v971_v30  ;;  %v493_v33 = vsel %vm55_vm1, %v1143_v22, %v970_v31 }
 0x803   :  { %v752_v34 = vpack.c.bf16 %v751_v32, %v493_v33 }
 0x805   :  { %955 = vmatpush3.bf16.msra.mxu0 %v752_v34 }
 0x808   :  { %957 = vmatmul.mubr.msk.bf16.vlgmr.msra.gmra.mxu0 %vm167_vm3, %v977_v35 }
 0x80c   :  { %v756_v36 = vpop.permute.xlu1 %755 }
 0x8c8   :  { %v805_v37 = vpop.f32.mrf.mxu0 }
 0x8c9   :  { %v806_v38 = vadd.f32 %v805_v37, %v756_v36 }
 0x8ca   :  { %v958_v39 = vpop.f32.mrf.mxu0 }
 0x8cb   :  { %v860_v40 = vpack.c.bf16 %v806_v38, %v806_v38 }
 0x8cc   :  { %v808_v42 = vpop.f32.mrf.mxu0 }
 0x8cd   :  { %821 = vst.msk [vmem:[%s1202_s7] sm:$0xf] %vm820_vm4, %v860_v40  ;;  %v809_v22 = vadd.f32 %v808_v42, %v761_v41  ;;  %823 = vrot.lane.b32.xlu1 %v860_v40, %s998_s3 }
 0x8ce   :  { %v959_v43 = vpop.f32.mrf.mxu0 }
 0x8cf   :  { %v861_v44 = vpack.c.bf16 %v809_v22, %v809_v22 }
 0x8d1   :  { %822 = vst.msk [vmem:[%s1202_s7 + $0x4] sm:$0xf] %vm820_vm4, %v861_v44  ;;  %825 = vrot.lane.b32.xlu0 %v861_v44, %s998_s3 }
 0x93f   :  { %v824_v45 = vpop.permute.xlu1 %823 }
 0x940   :  { %858 = vst.msk [vmem:[%s1202_s7 + $0x8] sm:$0xf] %vm820_vm4, %v824_v45 }
 0x943   :  { %v826_v46 = vpop.permute.xlu0 %825 }
 0x944   :  { %859 = vst.msk [vmem:[%s1202_s7 + $0xc] sm:$0xf] %vm820_vm4, %v826_v46 }

</bundles_post_ra>
